<compile_context>
chip_gen: v5e
topology: v5e:2x2
jax: 0.10.0
libtpu: 0.0.40
codegen_flags: <defaults>
</compile_context>

<pallas_src>
import functools

import jax
import jax.numpy as jnp
import numpy as np
from jax import lax
from jax.experimental import pallas as pl
from jax.experimental.pallas import tpu as pltpu


def _round_up(x: int, n: int) -> int:
    return (x + n - 1) // n * n


def _generation_defaults():
    """Tile sizes / VMEM budget by TPU generation (conservative fallback)."""
    kind = ""
    try:
        kind = jax.devices()[0].device_kind.lower()
    except Exception:  # no devices / CPU fallback during tracing
        pass
    if "v7" in kind:
        # v7x: 64 MiB VMEM per TensorCore -> keep double-buffered working set
        # well under budget (1024x1024 config uses ~20-28 MiB f32).
        return 1024, 1024, 512, 48 * 1024 * 1024
    # v5e / v6e: 128 MiB VMEM; 1024 tiles clear the HBM roofline on v6e.
    return 1024, 1024, 512, 96 * 1024 * 1024


def _linear_kernel_f32(x_ref, w_ref, o_ref):
    """f32 output: accumulate directly into the resident output tile."""
    @pl.when(pl.program_id(2) == 0)
    def _init():
        o_ref[...] = jnp.zeros_like(o_ref)

    # x @ W.T without materializing a transpose: contract dim 1 of both
    # operands (MXU transposed-RHS feed).
    o_ref[...] += lax.dot_general(
        x_ref[...],
        w_ref[...],
        dimension_numbers=(((1,), (1,)), ((), ())),
        preferred_element_type=jnp.float32,
    )


def _linear_kernel_acc(x_ref, w_ref, o_ref, acc_ref):
    """Non-f32 output: f32 scratch accumulator + final cast."""
    @pl.when(pl.program_id(2) == 0)
    def _init():
        acc_ref[...] = jnp.zeros_like(acc_ref)

    acc_ref[...] += lax.dot_general(
        x_ref[...],
        w_ref[...],
        dimension_numbers=(((1,), (1,)), ((), ())),
        preferred_element_type=jnp.float32,
    )

    @pl.when(pl.program_id(2) == pl.num_programs(2) - 1)
    def _finalize():
        o_ref[...] = acc_ref[...].astype(o_ref.dtype)


@functools.partial(jax.jit, static_argnames=("tm", "tn", "tk"))
def linear_forward(x: jax.Array, weight: jax.Array, *,
                   tm: int | None = None,
                   tn: int | None = None,
                   tk: int | None = None) -> jax.Array:
    """y = x @ weight.T  with a tiled Pallas TPU kernel.

    x:      (..., d_in)
    weight: (d_out, d_in)
    returns (..., d_out)
    """
    d_out, d_in = weight.shape
    assert x.shape[-1] == d_in, (x.shape, weight.shape)

    def_tm, def_tn, def_tk, vmem_limit = _generation_defaults()
    tm = def_tm if tm is None else tm
    tn = def_tn if tn is None else tn
    tk = def_tk if tk is None else tk

    # Single compute dtype (mixed inputs are promoted, matching jnp semantics).
    compute_dtype = jnp.result_type(x.dtype, weight.dtype)

    lead_shape = x.shape[:-1]
    m = int(np.prod(lead_shape)) if lead_shape else 1

    # Degenerate shape guard (empty leading dims).
    if m == 0 or d_out == 0:
        return jnp.zeros((*lead_shape, d_out), dtype=compute_dtype)

    x2d = x.reshape(m, d_in).astype(compute_dtype)
    w_p = weight.astype(compute_dtype)

    # Sublane packing: 8 rows for 32-bit, 16 for bf16.
    sub = 16 if compute_dtype == jnp.bfloat16 else 8

    # Pad every dim to (sublane, lane) alignment, then to a multiple of the
    # chosen tile so the grid is exact and the hot loop uses unmasked vld/vst.
    m_pad = _round_up(m, sub)
    k_pad = _round_up(d_in, 128)
    n_pad = _round_up(d_out, 128)

    tm = min(tm, m_pad)
    tk = min(tk, k_pad)
    tn = min(tn, n_pad)

    m_pad = _round_up(m_pad, tm)
    k_pad = _round_up(k_pad, tk)
    n_pad = _round_up(n_pad, tn)

    # Megacore guard (v7x has 2 TCs): make sure the parallel axes expose at
    # least two blocks when the problem is big enough to split.
    if (m_pad // tm) * (n_pad // tn) < 2:
        if n_pad % 256 == 0 and tn == n_pad:
            tn = n_pad // 2
        elif m_pad % (2 * sub) == 0 and tm == m_pad and m_pad >= 2 * sub:
            tm = m_pad // 2

    # Zero-padding K contributes 0 to the accumulation -> numerically exact.
    if (m_pad, k_pad) != (m, d_in):
        x2d = jnp.pad(x2d, ((0, m_pad - m), (0, k_pad - d_in)))
    if (n_pad, k_pad) != (d_out, d_in):
        # TODO(synk): hoist this pad to parameter-prep time for repeated calls.
        w_p = jnp.pad(w_p, ((0, n_pad - d_out), (0, k_pad - d_in)))

    grid_m, grid_n, grid_k = m_pad // tm, n_pad // tn, k_pad // tk
    grid = (grid_m, grid_n, grid_k)

    itemsize = jnp.dtype(compute_dtype).itemsize
    # Real HBM traffic: x is streamed grid_n times, W grid_m times.
    cost = pl.CostEstimate(
        flops=2 * m_pad * k_pad * n_pad,
        transcendentals=0,
        bytes_accessed=(m_pad * k_pad * itemsize * grid_n
                        + n_pad * k_pad * itemsize * grid_m
                        + m_pad * n_pad * itemsize),
    )

    out_is_f32 = compute_dtype == jnp.float32
    kernel = _linear_kernel_f32 if out_is_f32 else _linear_kernel_acc
    scratch_shapes = [] if out_is_f32 else [pltpu.VMEM((tm, tn), jnp.float32)]

    out2d = pl.pallas_call(
        kernel,
        out_shape=jax.ShapeDtypeStruct((m_pad, n_pad), compute_dtype),
        grid_spec=pltpu.PrefetchScalarGridSpec(
            num_scalar_prefetch=0,
            grid=grid,
            in_specs=[
                # x tile: depends on (M, K) grid indices only.
                pl.BlockSpec((tm, tk), lambda i, j, k: (i, k)),
                # weight tile: ignores the M index -> reusable across M tiles.
                pl.BlockSpec((tn, tk), lambda i, j, k: (j, k)),
            ],
            out_specs=pl.BlockSpec((tm, tn), lambda i, j, k: (i, j)),
            scratch_shapes=scratch_shapes,
        ),
        compiler_params=pltpu.CompilerParams(
            dimension_semantics=("parallel", "parallel", "arbitrary"),
            vmem_limit_bytes=vmem_limit,
        ),
        cost_estimate=cost,
    )(x2d, w_p)

    out2d = out2d[:m, :d_out]
    return out2d.reshape(*lead_shape, d_out)


def init_linear_weight(key, in_features: int, out_features: int,
                       dtype=jnp.float32) -> jax.Array:
    """Deterministic trunc-normal init matching the PyTorch module:
    std = sqrt(2/(in+out)), truncated at +/- 3*std."""
    std = np.sqrt(2.0 / (in_features + out_features))
    w = jax.random.truncated_normal(
        key, lower=-3.0, upper=3.0, shape=(out_features, in_features),
        dtype=jnp.float32,
    ) * std
    return w.astype(dtype)


if __name__ == "__main__":
    key = jax.random.PRNGKey(0)
    kx, kw, kx2, kw2, kx3, kw3 = jax.random.split(key, 6)

    # Aligned small case (f32 fast path, direct o_ref accumulation).
    batch, seq, d_in, d_out = 2, 8, 32, 64
    x = jax.random.normal(kx, (batch, seq, d_in), dtype=jnp.float32)
    weight = init_linear_weight(kw, d_in, d_out, dtype=jnp.float32)

    y = jax.block_until_ready(linear_forward(x, weight))
    y_ref = jnp.einsum("oi,bsi->bso", weight, x)
    assert y.shape == (batch, seq, d_out)
    np.testing.assert_allclose(np.asarray(y), np.asarray(y_ref),
                               rtol=1e-5, atol=1e-5)

    # Ragged (non-8/128-aligned) case exercising the padding path.
    b2, s2, di2, do2 = 2, 5, 40, 72
    x2 = jax.random.normal(kx2, (b2, s2, di2), dtype=jnp.float32)
    w2 = init_linear_weight(kw2, di2, do2, dtype=jnp.float32)
    y2 = jax.block_until_ready(linear_forward(x2, w2))
    y2_ref = jnp.einsum("oi,bsi->bso", w2, x2)
    assert y2.shape == (b2, s2, do2)
    np.testing.assert_allclose(np.asarray(y2), np.asarray(y2_ref),
                               rtol=1e-5, atol=1e-5)

    # bf16 case (scratch-accumulator path, f32 accumulation, bf16 output).
    b3, s3, di3, do3 = 2, 8, 32, 64
    x3 = jax.random.normal(kx3, (b3, s3, di3), dtype=jnp.float32).astype(jnp.bfloat16)
    w3 = init_linear_weight(kw3, di3, do3, dtype=jnp.bfloat16)
    y3 = jax.block_until_ready(linear_forward(x3, w3))
    y3_ref = jnp.einsum("oi,bsi->bso", w3.astype(jnp.float32),
                        x3.astype(jnp.float32))
    assert y3.shape == (b3, s3, do3) and y3.dtype == jnp.bfloat16
    np.testing.assert_allclose(np.asarray(y3, dtype=np.float32),
                               np.asarray(y3_ref), rtol=2e-2, atol=2e-2)

    print("KERNEL_OK")
</pallas_src>

<mosaic_0001>
module attributes {stable_mosaic.version = 11 : i64} {
  func.func @_linear_kernel_f32(%arg0: i32, %arg1: i32, %arg2: i32, %arg3: memref<8x128xf32, #tpu.memory_space<vmem>>, %arg4: memref<128x128xf32, #tpu.memory_space<vmem>>, %arg5: memref<8x128xf32, #tpu.memory_space<vmem>>) attributes {dimension_semantics = [#tpu.dimension_semantics<parallel>, #tpu.dimension_semantics<parallel>, #tpu.dimension_semantics<arbitrary>], iteration_bounds = array<i64: 2, 1, 1>, scalar_prefetch = 0 : i64, scratch_operands = 0 : i64, tpu.core_type = #tpu.core_type<tc>, window_params = [{transform_indices = @transform_0, window_bounds = array<i64: 8, 128>}, {transform_indices = @transform_1, window_bounds = array<i64: 128, 128>}, {transform_indices = @transform_2, window_bounds = array<i64: 8, 128>}]} {
    %c0_i32 = arith.constant 0 : i32
    %0 = arith.cmpi eq, %arg2, %c0_i32 : i32
    %1 = arith.extui %0 : i1 to i32
    %c0_i32_0 = arith.constant 0 : i32
    %2 = arith.cmpi ne, %1, %c0_i32_0 : i32
    scf.if %2 {
      %cst_8 = arith.constant 0.000000e+00 : f32
      %9 = vector.broadcast %cst_8 : f32 to vector<8x128xf32>
      %c0_9 = arith.constant 0 : index
      %c0_10 = arith.constant 0 : index
      %10 = vector.load %arg5[%c0_9, %c0_10] : memref<8x128xf32, #tpu.memory_space<vmem>>, vector<8x128xf32>
      tpu.vector_store %arg5[%c0_9, %c0_10], %9 {strides = array<i32>} : memref<8x128xf32, #tpu.memory_space<vmem>>, vector<8x128xf32>,
    } else {
    }
    %c0 = arith.constant 0 : index
    %c0_1 = arith.constant 0 : index
    %3 = vector.load %arg5[%c0, %c0_1] : memref<8x128xf32, #tpu.memory_space<vmem>>, vector<8x128xf32>
    %c0_2 = arith.constant 0 : index
    %c0_3 = arith.constant 0 : index
    %4 = vector.load %arg3[%c0_2, %c0_3] : memref<8x128xf32, #tpu.memory_space<vmem>>, vector<8x128xf32>
    %c0_4 = arith.constant 0 : index
    %c0_5 = arith.constant 0 : index
    %5 = vector.load %arg4[%c0_4, %c0_5] : memref<128x128xf32, #tpu.memory_space<vmem>>, vector<128x128xf32>
    %cst = arith.constant dense<0.000000e+00> : vector<8x128xf32>
    %6 = tpu.matmul %4, %5, %cst {dimension_numbers = #tpu.dot_dimension_numbers<[1], [1], [0], [0], [0, 0, 1, 0], [], []>} : vector<8x128xf32>, vector<128x128xf32>, vector<8x128xf32> -> vector<8x128xf32>
    %7 = arith.addf %3, %6 : vector<8x128xf32>
    %c0_6 = arith.constant 0 : index
    %c0_7 = arith.constant 0 : index
    %8 = vector.load %arg5[%c0_6, %c0_7] : memref<8x128xf32, #tpu.memory_space<vmem>>, vector<8x128xf32>
    tpu.vector_store %arg5[%c0_6, %c0_7], %7 {strides = array<i32>} : memref<8x128xf32, #tpu.memory_space<vmem>>, vector<8x128xf32>,
    return
  }
  func.func @transform_0(%arg0: i32, %arg1: i32, %arg2: i32) -> (i32, i32) {
    %c0_i32 = arith.constant 0 : i32
    return %arg0, %arg2 : i32, i32
  }
  func.func @transform_1(%arg0: i32, %arg1: i32, %arg2: i32) -> (i32, i32) {
    %c0_i32 = arith.constant 0 : i32
    return %arg1, %arg2 : i32, i32
  }
  func.func @transform_2(%arg0: i32, %arg1: i32, %arg2: i32) -> (i32, i32) {
    %c0_i32 = arith.constant 0 : i32
    return %arg0, %arg1 : i32, i32
  }
}

</mosaic_0001>

<bundles_post_ra>
// kernel: linear_forward.1
= control target key start
LH: loop header
LB: loop body
LE: loop exit
PB: predicated region body
PF: predicated region fallthrough
CT: control target
= control target key end

     0   :  { %s425_s9 = smov 0   ;;  %s427_s10 = smov 0   ;;  %s510_s0 = inlined_call_operand.vmem [shape: f32[16,128], index: 0, kind: input, shape index: {}]   ;;  %s511_s1 = inlined_call_operand.vmem [shape: f32[128,128], index: 1, kind: input, shape index: {}]   ;;  %s512_s2 = inlined_call_operand.vmem [shape: f32[16,128], index: 2, kind: output, shape index: {}]  }
   0x1   :  { %s429_s11 = smov 0  }
   0x2 LB: > { %s31_s12 = sadd.s32 1, %s404_s10  ;;  %p356_p0 = scmp.ge.s32.totalorder %s408_s11, 1  ;;  %s408_s11 = sphi %s429_s11, %s12_s11   ;;  %s404_s10 = sphi %s427_s10, %s514_s10   ;;  %s400_s9 = sphi %s425_s9, %s513_s9  }
   0x3   : > { %p33_p1 = scmp.ge.s32.totalorder %s31_s12, 2  ;;  %p153_p2 = scmp.lt.s32.totalorder %s408_s11, 3 }
   0x5   : > { %s516_s12 = smov (%p33_p1, %s31_s12), 0  ;;  %p154_p3 = pnand %p356_p0, %p153_p2 }
   0x6   : > { %p187_p4 = scmp.lt.s32.totalorder (!%p154_p3), %s400_s9, 1 }
   0x7   : > { %157 = sbr.rel (%p154_p3) target bundleno = 203 (0xcb), region = 28 }
   0xc   : > { %v232_v0 = vld [vmem:[%s511_s1 + $0x78] sm:$0xff]  ;;  %v231_v1 = vld [vmem:[%s511_s1 + $0x70] sm:$0xff]  ;;  %v230_v2 = vld [vmem:[%s511_s1 + $0x68] sm:$0xff]  ;;  %s518_s9 = smov (!%p187_p4, %s400_s9), 1 }
   0xd   : > { %233 = vmatpush.xpose.msra.mxu0 %v232_v0  ;;  %v229_v3 = vld [vmem:[%s511_s1 + $0x60] sm:$0xff]  ;;  %v228_v4 = vld [vmem:[%s511_s1 + $0x58] sm:$0xff]  ;;  %v227_v5 = vld [vmem:[%s511_s1 + $0x50] sm:$0xff]  ;;  %s357_s19 = sshll.u32 %s518_s9, 3 }
   0xe   : > { %v226_v6 = vld [vmem:[%s511_s1 + $0x48] sm:$0xff]  ;;  %v225_v7 = vld [vmem:[%s511_s1 + $0x40] sm:$0xff]  ;;  %v224_v8 = vld [vmem:[%s511_s1 + $0x38] sm:$0xff]  ;;  %s193_s24 = scalar_lea.vmem %s510_s0, %s357_s19  ;;  %s209_s27 = scalar_lea.vmem %s512_s2, %s357_s19 }
   0xf   : > { %v223_v9 = vld [vmem:[%s511_s1 + $0x30] sm:$0xff]  ;;  %v222_v10 = vld [vmem:[%s511_s1 + $0x28] sm:$0xff]  ;;  %v221_v11 = vld [vmem:[%s511_s1 + $0x20] sm:$0xff] }
  0x10   : > { %v220_v12 = vld [vmem:[%s511_s1 + $0x18] sm:$0xff]  ;;  %v219_v13 = vld [vmem:[%s511_s1 + $0x10] sm:$0xff]  ;;  %v218_v14 = vld [vmem:[%s511_s1 + $0x8] sm:$0xff] }
  0x11   : > { %234 = vmatpush.xpose.msra.mxu0 %v231_v1  ;;  %v217_v15 = vld [vmem:[%s511_s1] sm:$0xff] }
  0x12   : > { %v216_v16 = vld [vmem:[%s193_s24] sm:$0xff] }
  0x15   : > { %235 = vmatpush.xpose.msra.mxu0 %v230_v2 }
  0x19   : > { %236 = vmatpush.xpose.msra.mxu0 %v229_v3 }
  0x1d   : > { %237 = vmatpush.xpose.msra.mxu0 %v228_v4 }
  0x21   : > { %238 = vmatpush.xpose.msra.mxu0 %v227_v5 }
  0x25   : > { %239 = vmatpush.xpose.msra.mxu0 %v226_v6 }
  0x29   : > { %240 = vmatpush.xpose.msra.mxu0 %v225_v7 }
  0x2d   : > { %241 = vmatpush.xpose.msra.mxu0 %v224_v8 }
  0x31   : > { %242 = vmatpush.xpose.msra.mxu0 %v223_v9 }
  0x35   : > { %243 = vmatpush.xpose.msra.mxu0 %v222_v10 }
  0x39   : > { %244 = vmatpush.xpose.msra.mxu0 %v221_v11 }
  0x3d   : > { %245 = vmatpush.xpose.msra.mxu0 %v220_v12 }
  0x41   : > { %246 = vmatpush.xpose.msra.mxu0 %v219_v13 }
  0x45   : > { %247 = vmatpush.xpose.msra.mxu0 %v218_v14 }
  0x49   : > { %248 = vmatpush.xpose.msra.mxu0 %v217_v15 }
  0x4c   : > { %249 = vmatmul.f32.vlgmr.msra.gmra.mxu0 %v216_v16 }
  0xc9   : > { %v250_v17 = vpop.f32.mrf.mxu0 }
  0xca   : > { %254 = vst [vmem:[%s209_s27] sm:$0xff] %v250_v17 }
  0xcb PF: > { %s12_s11 = sadd.s32 1, %s408_s11   ;;  %s513_s9 = smov %s404_s10 }
  0xcc   : > { %p9_p5 = scmp.ge.s32.totalorder %s12_s11, 4   ;;  %s514_s10 = smov %s516_s12 }
  0xce   :  { %11 = sbr.rel (!%p9_p5) target bundleno = 2 (0x2), region = 65 }

</bundles_post_ra>
